<compile_context>
chip_gen: v7x
topology: tpu7x:2x2x1
jax: 0.10.0
libtpu: 0.0.40
codegen_flags: <defaults>
</compile_context>

<pallas_src>
import functools

import jax
import jax.numpy as jnp
from jax.experimental import pallas as pl
from jax.experimental.pallas import tpu as pltpu


# ----------------------------------------------------------------------------
# Kernel
# ----------------------------------------------------------------------------

def _mlp_kernel(x_ref, w1_ref, b1_ref, w2_ref, b2_ref, alpha_ref, o_ref,
                *, compute_dtype):
    """Fused 1x1 conv -> PReLU -> 1x1 conv on one (Cin, TN) column tile.

    x_ref:  (1, Cin, TN)   activation tile (channels on sublanes, spatial on lanes)
    w1_ref: (Ch, Cin)      conv1 weight (PyTorch layout, 1x1 squeezed)
    b1_ref: (Ch, 1)        conv1 bias (f32, lane-broadcast)
    w2_ref: (Cout, Ch)     conv2 weight
    b2_ref: (Cout, 1)      conv2 bias
    alpha_ref: (1,) f32 in SMEM -- shared PReLU slope (nn.PReLU() default)
    o_ref:  (1, Cout, TN)
    """
    x = x_ref[0].astype(compute_dtype)                       # (Cin, TN)

    # conv1: MXU matmul, f32 accumulation; bias + PReLU in f32 on the VPU.
    h = jnp.dot(w1_ref[...], x, preferred_element_type=jnp.float32)  # (Ch, TN)
    h = h + b1_ref[...]
    alpha = alpha_ref[0]
    h = jnp.where(h >= 0.0, h, alpha * h)                    # PReLU (shared alpha)

    # conv2
    y = jnp.dot(w2_ref[...], h.astype(compute_dtype),
                preferred_element_type=jnp.float32)          # (Cout, TN)
    y = y + b2_ref[...]
    o_ref[0] = y.astype(o_ref.dtype)


# ----------------------------------------------------------------------------
# Wrapper
# ----------------------------------------------------------------------------

def _pick_spatial_tile(hw, cin, ch, cout, act_bytes, w_bytes,
                       vmem_budget=12 * 1024 * 1024):
    """Largest lane-aligned spatial tile whose pipelined footprint fits VMEM.

    Footprint model: double-buffered input (Cin,TN) and output (Cout,TN) tiles,
    resident (double-buffered) weights/biases, plus f32 temporaries for the
    hidden/output activations.  The 12 MiB budget stays under the scoped-VMEM
    defaults of v5e (16 MiB), v6e (32 MiB) and v7x (32 MiB scoped / 64 MiB phys).
    """
    if hw <= 128:
        return hw                                  # full extent (always legal)
    weight_bytes = 2 * (ch * cin + cout * ch) * w_bytes + 8 * (ch + cout)
    per_col = (2 * cin * act_bytes                 # input tile, double buffered
               + 2 * cout * act_bytes              # output tile, double buffered
               + 4 * (ch + cout))                  # f32 temporaries (h, y)
    tn = (vmem_budget - weight_bytes) // per_col
    tn = max(128, min(int(tn), 4096))
    tn = (tn // 128) * 128                         # lane-aligned
    return hw if tn >= hw else tn


def mlp_forward(x, w1, b1, alpha, w2, b2, *, matmul_dtype=jnp.bfloat16):
    """Forward of the PyTorch `Mlp` module.

    x:  (B, Cin, H, W)  NCHW, as in the reference
    w1: (Ch, Cin), b1: (Ch,)      -- Conv2d(Cin, Ch, 1) weight/bias (1x1 squeezed)
    w2: (Cout, Ch), b2: (Cout,)   -- Conv2d(Ch, Cout, 1) weight/bias
    alpha: scalar PReLU slope (nn.PReLU() default: one shared parameter)
    Returns (B, Cout, H, W).
    """
    B, Cin, H, W = x.shape
    Ch, Cout = w1.shape[0], w2.shape[0]
    HW = H * W

    x2 = x.reshape(B, Cin, HW)                     # free reshape (no transpose)

    act_bytes = jnp.dtype(x.dtype).itemsize
    w_bytes = jnp.dtype(matmul_dtype).itemsize
    TN = _pick_spatial_tile(HW, Cin, Ch, Cout, act_bytes, w_bytes)
    grid = (B, pl.cdiv(HW, TN))

    w1c = w1.astype(matmul_dtype)
    w2c = w2.astype(matmul_dtype)
    b1c = b1.reshape(Ch, 1).astype(jnp.float32)
    b2c = b2.reshape(Cout, 1).astype(jnp.float32)
    alpha_arr = jnp.asarray(alpha, jnp.float32).reshape(1)

    def full(shape):
        return pl.BlockSpec(shape, lambda b, j: (0, 0))

    out = pl.pallas_call(
        functools.partial(_mlp_kernel, compute_dtype=matmul_dtype),
        grid=grid,
        in_specs=[
            pl.BlockSpec((1, Cin, TN), lambda b, j: (b, 0, j)),      # x tile
            full((Ch, Cin)), full((Ch, 1)),                          # conv1 w/b
            full((Cout, Ch)), full((Cout, 1)),                       # conv2 w/b
            pl.BlockSpec(memory_space=pltpu.MemorySpace.SMEM),       # PReLU alpha
        ],
        out_specs=pl.BlockSpec((1, Cout, TN), lambda b, j: (b, 0, j)),
        out_shape=jax.ShapeDtypeStruct((B, Cout, HW), x.dtype),
        compiler_params=pltpu.CompilerParams(
            dimension_semantics=("parallel", "parallel"),
            vmem_limit_bytes=32 * 1024 * 1024),
    )(x2, w1c, b1c, w2c, b2c, alpha_arr)

    return out.reshape(B, Cout, H, W)


# ----------------------------------------------------------------------------
# Demo / self-check
# ----------------------------------------------------------------------------

if __name__ == "__main__":
    key = jax.random.PRNGKey(0)
    B, Cin, H, W = 2, 32, 16, 16       # NCHW input, H*W = 256 (lane-dense)
    Ch, Cout = 64, 32                  # hidden_features, out_features

    k = jax.random.split(key, 5)
    x = jax.random.normal(k[0], (B, Cin, H, W), jnp.float32)
    w1 = 0.02 * jax.random.normal(k[1], (Ch, Cin), jnp.float32)
    b1 = 0.02 * jax.random.normal(k[2], (Ch,), jnp.float32)
    w2 = 0.02 * jax.random.normal(k[3], (Cout, Ch), jnp.float32)
    b2 = 0.02 * jax.random.normal(k[4], (Cout,), jnp.float32)
    alpha = 0.25                       # PyTorch nn.PReLU() default init

    out = jax.block_until_ready(mlp_forward(x, w1, b1, alpha, w2, b2))
    assert out.shape == (B, Cout, H, W) and out.dtype == x.dtype

    # Pure-JAX f32 reference (1x1 conv == channel matmul).  Loose tolerance
    # because the kernel uses bf16 MXU inputs with f32 accumulation.
    xr = x.reshape(B, Cin, H * W)
    h_ref = jnp.einsum('oc,bcn->bon', w1, xr) + b1[None, :, None]
    h_ref = jnp.where(h_ref >= 0, h_ref, alpha * h_ref)
    ref = jnp.einsum('oc,bcn->bon', w2, h_ref) + b2[None, :, None]
    ref = ref.reshape(B, Cout, H, W)
    assert jnp.allclose(out, ref, atol=1e-2, rtol=5e-2), \
        float(jnp.max(jnp.abs(out - ref)))

    print("KERNEL_OK")
</pallas_src>

<mosaic_0001>
module attributes {stable_mosaic.version = 11 : i64} {
  func.func @_mlp_kernel(%arg0: i32, %arg1: i32, %arg2: memref<1x32x256xf32, #tpu.memory_space<vmem>>, %arg3: memref<64x32xbf16, #tpu.memory_space<vmem>>, %arg4: memref<64x1xf32, #tpu.memory_space<vmem>>, %arg5: memref<32x64xbf16, #tpu.memory_space<vmem>>, %arg6: memref<32x1xf32, #tpu.memory_space<vmem>>, %arg7: memref<1xf32, #tpu.memory_space<smem>>, %arg8: memref<1x32x256xf32, #tpu.memory_space<vmem>>) attributes {dimension_semantics = [#tpu.dimension_semantics<parallel>, #tpu.dimension_semantics<parallel>], iteration_bounds = array<i64: 2, 1>, scalar_prefetch = 0 : i64, scratch_operands = 0 : i64, tpu.core_type = #tpu.core_type<tc>, window_params = [{transform_indices = @transform_0, window_bounds = array<i64: 1, 32, 256>}, {pipeline_mode = #tpu.pipeline_mode<synchronous>, transform_indices = @transform_1, window_bounds = array<i64: 64, 32>}, {pipeline_mode = #tpu.pipeline_mode<synchronous>, transform_indices = @transform_2, window_bounds = array<i64: 64, 1>}, {pipeline_mode = #tpu.pipeline_mode<synchronous>, transform_indices = @transform_3, window_bounds = array<i64: 32, 64>}, {pipeline_mode = #tpu.pipeline_mode<synchronous>, transform_indices = @transform_4, window_bounds = array<i64: 32, 1>}, {transform_indices = @transform_5, window_bounds = array<i64: 1>}, {transform_indices = @transform_6, window_bounds = array<i64: 1, 32, 256>}]} {
    %c0 = arith.constant 0 : index
    %c0_0 = arith.constant 0 : index
    %c0_1 = arith.constant 0 : index
    %0 = vector.load %arg2[%c0, %c0_0, %c0_1] : memref<1x32x256xf32, #tpu.memory_space<vmem>>, vector<1x32x256xf32>
    %1 = vector.shape_cast %0 : vector<1x32x256xf32> to vector<32x256xf32>
    %2 = arith.truncf %1 : vector<32x256xf32> to vector<32x256xbf16>
    %c0_2 = arith.constant 0 : index
    %c0_3 = arith.constant 0 : index
    %3 = vector.load %arg3[%c0_2, %c0_3] : memref<64x32xbf16, #tpu.memory_space<vmem>>, vector<64x32xbf16>
    %cst = arith.constant dense<0.000000e+00> : vector<64x256xf32>
    %4 = tpu.matmul %3, %2, %cst {dimension_numbers = #tpu.dot_dimension_numbers<[1], [0], [0], [1], [0, 0, 1, 1], [], []>} : vector<64x32xbf16>, vector<32x256xbf16>, vector<64x256xf32> -> vector<64x256xf32>
    %c0_4 = arith.constant 0 : index
    %c0_5 = arith.constant 0 : index
    %5 = vector.load %arg4[%c0_4, %c0_5] : memref<64x1xf32, #tpu.memory_space<vmem>>, vector<64x1xf32>
    %6 = vector.broadcast %5 : vector<64x1xf32> to vector<64x256xf32>
    %7 = arith.addf %4, %6 : vector<64x256xf32>
    %c0_6 = arith.constant 0 : index
    %8 = memref.load %arg7[%c0_6] : memref<1xf32, #tpu.memory_space<smem>>
    %cst_7 = arith.constant 0.000000e+00 : f32
    %9 = vector.broadcast %cst_7 : f32 to vector<64x256xf32>
    %10 = arith.cmpf oge, %7, %9 : vector<64x256xf32>
    %11 = vector.broadcast %8 : f32 to vector<64x256xf32>
    %12 = arith.mulf %11, %7 : vector<64x256xf32>
    %13 = arith.select %10, %7, %12 : vector<64x256xi1>, vector<64x256xf32>
    %c0_8 = arith.constant 0 : index
    %c0_9 = arith.constant 0 : index
    %14 = vector.load %arg5[%c0_8, %c0_9] : memref<32x64xbf16, #tpu.memory_space<vmem>>, vector<32x64xbf16>
    %15 = arith.truncf %13 : vector<64x256xf32> to vector<64x256xbf16>
    %cst_10 = arith.constant dense<0.000000e+00> : vector<32x256xf32>
    %16 = tpu.matmul %14, %15, %cst_10 {dimension_numbers = #tpu.dot_dimension_numbers<[1], [0], [0], [1], [0, 0, 1, 1], [], []>} : vector<32x64xbf16>, vector<64x256xbf16>, vector<32x256xf32> -> vector<32x256xf32>
    %c0_11 = arith.constant 0 : index
    %c0_12 = arith.constant 0 : index
    %17 = vector.load %arg6[%c0_11, %c0_12] : memref<32x1xf32, #tpu.memory_space<vmem>>, vector<32x1xf32>
    %18 = vector.broadcast %17 : vector<32x1xf32> to vector<32x256xf32>
    %19 = arith.addf %16, %18 : vector<32x256xf32>
    %c0_13 = arith.constant 0 : index
    %c0_14 = arith.constant 0 : index
    %c0_15 = arith.constant 0 : index
    %20 = vector.load %arg8[%c0_13, %c0_14, %c0_15] : memref<1x32x256xf32, #tpu.memory_space<vmem>>, vector<1x32x256xf32>
    %21 = vector.shape_cast %20 : vector<1x32x256xf32> to vector<32x256xf32>
    %22 = vector.shape_cast %19 : vector<32x256xf32> to vector<1x32x256xf32>
    tpu.vector_store %arg8[%c0_13, %c0_14, %c0_15], %22 {strides = array<i32>} : memref<1x32x256xf32, #tpu.memory_space<vmem>>, vector<1x32x256xf32>,
    return
  }
  func.func @transform_0(%arg0: i32, %arg1: i32) -> (i32, i32, i32) {
    %c0_i32 = arith.constant 0 : i32
    %c0_i32_0 = arith.constant 0 : i32
    return %arg0, %c0_i32, %arg1 : i32, i32, i32
  }
  func.func @transform_1(%arg0: i32, %arg1: i32) -> (i32, i32) {
    %c0_i32 = arith.constant 0 : i32
    %c0_i32_0 = arith.constant 0 : i32
    %c0_i32_1 = arith.constant 0 : i32
    return %c0_i32, %c0_i32_0 : i32, i32
  }
  func.func @transform_2(%arg0: i32, %arg1: i32) -> (i32, i32) {
    %c0_i32 = arith.constant 0 : i32
    %c0_i32_0 = arith.constant 0 : i32
    %c0_i32_1 = arith.constant 0 : i32
    return %c0_i32, %c0_i32_0 : i32, i32
  }
  func.func @transform_3(%arg0: i32, %arg1: i32) -> (i32, i32) {
    %c0_i32 = arith.constant 0 : i32
    %c0_i32_0 = arith.constant 0 : i32
    %c0_i32_1 = arith.constant 0 : i32
    return %c0_i32, %c0_i32_0 : i32, i32
  }
  func.func @transform_4(%arg0: i32, %arg1: i32) -> (i32, i32) {
    %c0_i32 = arith.constant 0 : i32
    %c0_i32_0 = arith.constant 0 : i32
    %c0_i32_1 = arith.constant 0 : i32
    return %c0_i32, %c0_i32_0 : i32, i32
  }
  func.func @transform_5(%arg0: i32, %arg1: i32) -> i32 {
    %c0_i32 = arith.constant 0 : i32
    %c0_i32_0 = arith.constant 0 : i32
    return %c0_i32 : i32
  }
  func.func @transform_6(%arg0: i32, %arg1: i32) -> (i32, i32, i32) {
    %c0_i32 = arith.constant 0 : i32
    %c0_i32_0 = arith.constant 0 : i32
    return %arg0, %c0_i32, %arg1 : i32, i32, i32
  }
}

</mosaic_0001>

<bundles_post_ra>
// kernel: tpu_custom_call.1
= control target key start
LH: loop header
LB: loop body
LE: loop exit
PB: predicated region body
PF: predicated region fallthrough
CT: control target
= control target key end

     0   :  { %s1134_s0 = inlined_call_operand.vmem [shape: f32[2,32,256], index: 0, kind: input, shape index: {}]   ;;  %s1135_s1 = inlined_call_operand.vmem [shape: bf16[64,32], index: 1, kind: input, shape index: {}]   ;;  %s1136_s2 = inlined_call_operand.vmem [shape: f32[64,1], index: 2, kind: input, shape index: {}]   ;;  %s1137_s3 = inlined_call_operand.vmem [shape: bf16[32,64], index: 3, kind: input, shape index: {}]   ;;  %s1138_s4 = inlined_call_operand.vmem [shape: f32[32,1], index: 4, kind: input, shape index: {}]   ;;  %s1139_s5 = inlined_call_operand.<no memory space> [shape: f32[1], index: 5, kind: input, shape index: {}]   ;;  %s1140_s6 = inlined_call_operand.hbm [shape: f32[2,32,256], index: 6, kind: output, shape index: {}]  }
   0x1   :  { %11 = sst [smem:[#allocation2]] %s1139_s5 }
   0x2   :  { %12 = vsyncpa [#allocation4], 0 }
   0x3   :  { %14 = vsyncpa [#allocation4 + $0x1], 0  ;;  %s931_s23 = smov 0   ;;  %s933_s24 = smov 0  }
   0x4   :  { %s935_s25 = smov 0   ;;  %s937_s26 = smov 0  }
   0x5   :  { %s939_s27 = smov 0   ;;  %s941_s28 = smov 0  }
   0x6 LB: > { %s716_s5 = sadd.s32 4294967295, %s887_s28   ;;  %s717_s29 = sadd.s32 4294967294, %s887_s28   ;;  %s887_s28 = sphi %s941_s28, %s20_s28   ;;  %s883_s27 = sphi %s939_s27, %s1147_s27   ;;  %s879_s26 = sphi %s937_s26, %s1146_s26   ;;  %s875_s25 = sphi %s935_s25, %s1145_s25   ;;  %s871_s24 = sphi %s933_s24, %s1144_s24   ;;  %s867_s23 = sphi %s931_s23, %s1143_s23  }
   0x7   : > { %s32_s30 = sadd.s32 1, %s883_s27  ;;  %s174_s7 = sadd.s32 1, %s875_s25 }
   0x8   : > { %p34_p0 = scmp.ge.s32.totalorder %s32_s30, 2  ;;  %p184_p1 = scmp.ne.s32.totalorder %s875_s25, %s871_s24 }
   0x9   : > { %p185_p2 = scmp.eq.s32.totalorder %s716_s5, 1  ;;  %p190_p3 = scmp.ne.s32.totalorder %s871_s24, %s867_s23 }
   0xa   : > { %s1149_s30 = smov (%p34_p0, %s32_s30), 0  ;;  %p191_p5 = scmp.eq.s32.totalorder %s717_s29, 1 }
   0xb   : > { %p971_p4 = por %p185_p2, %p184_p1  ;;  %s169_s9 = ssub.s32 %s883_s27, %s1149_s30 }
   0xc   : > { %p720_p6 = scmp.ge.s32.totalorder %s887_s28, 1  ;;  %p172_p7 = scmp.eq.s32.totalorder %s169_s9, 0 }
   0xd   : > { %p978_p8 = por %p191_p5, %p190_p3  ;;  %p237_p9 = scmp.lt.s32.totalorder %s887_s28, 3 }
   0xe   : > { %s984_s11 = scalar_select %p172_p7, %s875_s25, %s174_s7  }
   0xf   : > { %p238_p10 = pnand %p720_p6, %p237_p9 }
  0x10   : > { %p272_p11 = scmp.lt.s32.totalorder (!%p238_p10), %s879_s26, 1  ;;  %v889_v0 = vmov (!%p238_p10), 0   ;;  %v303_v1 = vld [vmem:[%s1136_s2] sm:$0xff] (!%p238_p10)  ;;  %v305_v2 = vld [vmem:[%s1136_s2 + $0x10] sm:$0xff] (!%p238_p10)  ;;  %v304_v3 = vld [vmem:[%s1136_s2 + $0x8] sm:$0xff] (!%p238_p10)  ;;  %vm371_vm0 = vcmask (!%p238_p10), 261120  }
  0x11   : > { %241 = sbr.rel (%p238_p10) target bundleno = 529 (0x211), region = 44  ;;  %416 = vmatprep.mubr.bf16.mxu0 (!%p238_p10), %v889_v0  ;;  %801 = vset.pattern.permute.xlu0 (!%p238_p10), %v889_v0  ;;  %v306_v4 = vld [vmem:[%s1136_s2 + $0x18] sm:$0xff] (!%p238_p10)  ;;  %v307_v17 = vld [vmem:[%s1136_s2 + $0x20] sm:$0xff] (!%p238_p10)  ;;  %v308_v18 = vld [vmem:[%s1136_s2 + $0x28] sm:$0xff] (!%p238_p10)  ;;  %s457_s19 = sld [smem:[#allocation2]] (!%p238_p10) }
  0x12   : > { %802 = vset.pattern.permute.xlu1 (!%p238_p10), %v889_v0  ;;  %592 = vmatprep.mubr.bf16.mxu1 (!%p238_p10), %v889_v0  ;;  %v803_v19 = vld [vmem:[%s1135_s1] sm:$0xff] (!%p238_p10)   ;;  %v309_v20 = vld [vmem:[%s1136_s2 + $0x30] sm:$0xff] (!%p238_p10)  ;;  %v310_v21 = vld [vmem:[%s1136_s2 + $0x38] sm:$0xff] (!%p238_p10)  ;;  %s268_s29 = sand.u32 (!%p238_p10), 1, %s871_s24   ;;  %s890_s18 = smov (!%p238_p10), [#allocation3]  }
  0x13   : > { %313 = vperm.xlu0 (!%p238_p10), %801, %v303_v1   ;;  %323 = vperm.xlu1 (!%p238_p10), %802, %v305_v2   ;;  %v519_v22 = vld [vmem:[%s1138_s4] sm:$0xff] (!%p238_p10)  ;;  %v520_v23 = vld [vmem:[%s1138_s4 + $0x8] sm:$0xff] (!%p238_p10)  ;;  %v521_v25 = vld [vmem:[%s1138_s4 + $0x10] sm:$0xff] (!%p238_p10)  ;;  %s721_s7 = sshll.u32 (!%p238_p10), %s268_s29, 6 }
  0x14   : > { %v804_v24 = vld [vmem:[%s1135_s1 + $0x8] sm:$0xff] (!%p238_p10)   ;;  %v522_v26 = vld [vmem:[%s1138_s4 + $0x18] sm:$0xff] (!%p238_p10)  ;;  %v805_v27 = vld [vmem:[%s1135_s1 + $0x10] sm:$0xff] (!%p238_p10)   ;;  %s270_s9 = scalar_lea.vmem (!%p238_p10), [#allocation3], %s721_s7 }
  0x15   : > { %v806_v28 = vld [vmem:[%s1135_s1 + $0x18] sm:$0xff] (!%p238_p10)  }
  0x17   : > { %318 = vperm.xlu0 (!%p238_p10), %801, %v304_v3   ;;  %328 = vperm.xlu1 (!%p238_p10), %802, %v306_v4   ;;  %v1050_v31 = vstv (!%p238_p10), %s457_s19  ;;  %s813_s19 = sshll.u32 (!%p238_p10), %s890_s18, 4  ;;  %s814_s19 = int_to_ptr.vmem [resolvable:$false] %s813_s19 }
  0x18   : > { %s273_s12 = scalar_select %p272_p11, %s879_s26, 1 }
  0x1a   : > { %s741_s13 = sshll.u32 %s273_s12, 6  ;;  %s742_s12 = sshll.u32 %s879_s26, 10 }
  0x1b   : > { %s279_s20 = scalar_lea.vmem %s1134_s0, %s741_s13  ;;  %333 = vperm.xlu0 %801, %v307_v17   ;;  %338 = vperm.xlu1 %802, %v308_v18   ;;  %s637_s13 = sshll.u32 %s270_s9, 4  ;;  %s1084_s13 = int_to_ptr.vmem [resolvable:$true] %s637_s13 }
  0x1c   : > { %v284_v5 = vld [vmem:[%s279_s20 + $0x8] sm:$0xff]  ;;  %v286_v6 = vld [vmem:[%s279_s20 + $0x18] sm:$0xff]  ;;  %v283_v7 = vld [vmem:[%s279_s20] sm:$0xff]  ;;  %s1082_s16 = scalar_lea.hbm %s1140_s6, %s742_s12  ;;  %s1088_s26 = scalar_lea.sflag [#allocation4], %s268_s29 }
  0x1d   : > { %v292_v8 = vpack.c.bf16 %v286_v6, %v284_v5  ;;  %v285_v9 = vld [vmem:[%s279_s20 + $0x10] sm:$0xff]  ;;  %v288_v10 = vld [vmem:[%s279_s20 + $0x28] sm:$0xff]  ;;  %v290_v11 = vld [vmem:[%s279_s20 + $0x38] sm:$0xff]  ;;  %s809_s17 = scalar_lea.vmem %s1084_s13, 1024  ;;  %p816_p1 = scmp.lt.s32.totalorder %s1084_s13, %s814_s19 }
  0x1e   : > { %v291_v12 = vpack.c.bf16 %v285_v9, %v283_v7  ;;  %v294_v13 = vpack.c.bf16 %v290_v11, %v288_v10  ;;  %v287_v14 = vld [vmem:[%s279_s20 + $0x20] sm:$0xff]  ;;  %v289_v15 = vld [vmem:[%s279_s20 + $0x30] sm:$0xff]  ;;  %p810_p12 = scmp.ne.s32.totalorder %s1084_s13, %s809_s17  ;;  %s815_s20 = scalar_lea.vmem %s814_s19, 2048 }
  0x1f   : > { %384 = vmatprep.subr.bf16.mxu0 %v292_v8  ;;  %v293_v16 = vpack.c.bf16 %v289_v15, %v287_v14  ;;  %343 = vperm.xlu0 %801, %v309_v20   ;;  %p817_p2 = scmp.lt.s32.totalorder %s815_s20, %s809_s17 }
  0x20   : > { %385 = vmatpush1.bf16.msra.mxu0 %v291_v12  ;;  %348 = vperm.xlu1 %802, %v310_v21   ;;  %p811_p13 = pnand %p810_p12, %p971_p4 }
  0x21   : > { %386 = vmatprep.subr.bf16.mxu0 %v294_v13  ;;  %p818_p3 = por %p817_p2, %p816_p1 }
  0x22   : > { %p812_p0 = pneg %p811_p13 }
  0x23   : > { %525 = vperm.xlu0 %801, %v519_v22  }
  0x24   : > { %387 = vmatpush1.bf16.msra.mxu0 %v293_v16  ;;  %530 = vperm.xlu1 %802, %v520_v23   ;;  %p819_p5 = pnand %p818_p3, %p812_p0 }
  0x27   : > { %728 = vmatmul.mubr.msk.bf16.vlgmr.msra.gmra.mrb[0].mxu0 %vm371_vm0, %v803_v19  ;;  %535 = vperm.xlu0 %801, %v521_v25  }
  0x28   : > { %426 = vmatprep.mubr.bf16.mxu0 %v889_v0  ;;  %540 = vperm.xlu1 %802, %v522_v26  }
  0x2f   : > { %729 = vmatmul.mubr.msk.bf16.gmra.mrb[4].mxu0 %vm371_vm0, %v804_v24 }
  0x30   : > { %436 = vmatprep.mubr.bf16.mxu0 %v889_v0 }
  0x37   : > { %730 = vmatmul.mubr.msk.bf16.gmra.mrb[8].mxu0 %vm371_vm0, %v805_v27 }
  0x38   : > { %446 = vmatprep.mubr.bf16.mxu0 %v889_v0 }
  0x3f   : > { %731 = vmatmul.mubr.msk.bf16.gmra.mrb[12].mxu0 %vm371_vm0, %v806_v28 }
  0x92   : > { %v314_v29 = vpop.permute.xlu0 %313  ;;  %v324_v40 = vpop.permute.xlu1 %323 }
  0x96   : > { %v319_v34 = vpop.permute.xlu0 %318  ;;  %v329_v54 = vpop.permute.xlu1 %328 }
  0x9a   : > { %v334_v3 = vpop.permute.xlu0 %333  ;;  %v339_v11 = vpop.permute.xlu1 %338 }
  0x9e   : > { %v344_v23 = vpop.permute.xlu0 %343 }
  0xfa   : > { %v418_v30 = vpop.f32.mrb[0].mxu0 }
  0xfb   : > { %v419_v32 = vadd.f32 %v418_v30, %v314_v29  ;;  %v420_v33 = vpop.f32.mrb[1].mxu0 }
  0xfc   : > { %v421_v35 = vadd.f32 %v420_v33, %v314_v29  ;;  %v422_v36 = vpop.f32.mrb[2].mxu0 }
  0xfd   : > { %v475_v37 = vmul.f32 %v1050_v31, %v419_v32  ;;  %v423_v38 = vadd.f32 %v422_v36, %v319_v34  ;;  %v424_v39 = vpop.f32.mrb[3].mxu0  ;;  %vm458_vm1 = vcmp.ge.f32.partialorder %v419_v32, 0.0 }
  0xfe   : > { %v476_v41 = vmul.f32 %v1050_v31, %v421_v35  ;;  %v425_v42 = vadd.f32 %v424_v39, %v319_v34  ;;  %vm459_vm2 = vcmp.ge.f32.partialorder %v421_v35, 0.0 }
  0xff   : > { %v477_v43 = vmul.f32 %v1050_v31, %v423_v38  ;;  %vm460_vm3 = vcmp.ge.f32.partialorder %v423_v38, 0.0  ;;  %v491_v45 = vsel %vm458_vm1, %v419_v32, %v475_v37  ;;  %v349_v32 = vpop.permute.xlu1 %348  ;;  %vm553_vm1 = vcmask 523264  }
 0x100   : > { %v478_v44 = vmul.f32 %v1050_v31, %v425_v42  ;;  %vm461_vm4 = vcmp.ge.f32.partialorder %v425_v42, 0.0  ;;  %v492_v48 = vsel %vm459_vm2, %v421_v35, %v476_v41 }
 0x101   : > { %v493_v46 = vsel %vm460_vm3, %v423_v38, %v477_v43 }
 0x102   : > { %v428_v47 = vpop.f32.mrb[4].mxu0  ;;  %v494_v49 = vsel %vm461_vm4, %v425_v42, %v478_v44  ;;  %v511_v50 = vpack.c.bf16 %v493_v46, %v491_v45 }
 0x103   : > { %v429_v51 = vadd.f32 %v428_v47, %v324_v40  ;;  %v430_v52 = vpop.f32.mrb[5].mxu0  ;;  %v512_v53 = vpack.c.bf16 %v494_v49, %v492_v48  ;;  %v807_v48 = vld [vmem:[%s1137_s3] sm:$0xff]   ;;  %v526_v49 = vpop.permute.xlu0 %525 }
 0x104   : > { %v431_v55 = vadd.f32 %v430_v52, %v324_v40  ;;  %v432_v56 = vpop.f32.mrb[6].mxu0 }
 0x105   : > { %v479_v57 = vmul.f32 %v1050_v31, %v429_v51  ;;  %v433_v58 = vadd.f32 %v432_v56, %v329_v54  ;;  %v434_v59 = vpop.f32.mrb[7].mxu0  ;;  %560 = vmatprep.subr.bf16.mxu1 %v512_v53  ;;  %vm462_vm5 = vcmp.ge.f32.partialorder %v429_v51, 0.0  ;;  %v531_v53 = vpop.permute.xlu1 %530 }
 0x106   : > { %v480_v60 = vmul.f32 %v1050_v31, %v431_v55  ;;  %v435_v61 = vadd.f32 %v434_v59, %v329_v54  ;;  %561 = vmatpush1.bf16.msra.mxu1 %v511_v50  ;;  %vm463_vm6 = vcmp.ge.f32.partialorder %v431_v55, 0.0 }
 0x107   : > { %vm464_vm7 = vcmp.ge.f32.partialorder %v433_v58, 0.0  ;;  %v481_v62 = vmul.f32 %v1050_v31, %v433_v58  ;;  %v495_v1 = vsel %vm462_vm5, %v429_v51, %v479_v57 }
 0x108   : > { %vm465_vm8 = vcmp.ge.f32.partialorder %v435_v61, 0.0  ;;  %v482_v63 = vmul.f32 %v1050_v31, %v435_v61  ;;  %v496_v5 = vsel %vm463_vm6, %v431_v55, %v480_v60 }
 0x109   : > { %v497_v2 = vsel %vm464_vm7, %v433_v58, %v481_v62  ;;  %v536_v58 = vpop.permute.xlu0 %535  ;;  %v541_v62 = vpop.permute.xlu1 %540 }
 0x10a   : > { %v438_v4 = vpop.f32.mrb[8].mxu0  ;;  %v498_v6 = vsel %vm465_vm8, %v435_v61, %v482_v63  ;;  %v513_v7 = vpack.c.bf16 %v497_v2, %v495_v1 }
 0x10b   : > { %v439_v8 = vadd.f32 %v438_v4, %v334_v3  ;;  %v440_v9 = vpop.f32.mrb[9].mxu0  ;;  %v514_v10 = vpack.c.bf16 %v498_v6, %v496_v5 }
 0x10c   : > { %v441_v12 = vadd.f32 %v440_v9, %v334_v3  ;;  %v442_v13 = vpop.f32.mrb[10].mxu0 }
 0x10d   : > { %v483_v14 = vmul.f32 %v1050_v31, %v439_v8  ;;  %v443_v15 = vadd.f32 %v442_v13, %v339_v11  ;;  %v444_v16 = vpop.f32.mrb[11].mxu0  ;;  %562 = vmatprep.subr.bf16.mxu1 %v514_v10  ;;  %vm466_vm9 = vcmp.ge.f32.partialorder %v439_v8, 0.0 }
 0x10e   : > { %v484_v17 = vmul.f32 %v1050_v31, %v441_v12  ;;  %v445_v18 = vadd.f32 %v444_v16, %v339_v11  ;;  %563 = vmatpush1.bf16.msra.mxu1 %v513_v7  ;;  %vm467_vm10 = vcmp.ge.f32.partialorder %v441_v12, 0.0 }
 0x10f   : > { %vm468_vm11 = vcmp.ge.f32.partialorder %v443_v15, 0.0  ;;  %v485_v19 = vmul.f32 %v1050_v31, %v443_v15  ;;  %v499_v21 = vsel %vm466_vm9, %v439_v8, %v483_v14 }
 0x110   : > { %vm469_vm12 = vcmp.ge.f32.partialorder %v445_v18, 0.0  ;;  %v486_v20 = vmul.f32 %v1050_v31, %v445_v18  ;;  %v500_v25 = vsel %vm467_vm10, %v441_v12, %v484_v17 }
 0x111   : > { %v501_v22 = vsel %vm468_vm11, %v443_v15, %v485_v19 }
 0x112   : > { %v448_v24 = vpop.f32.mrb[12].mxu0  ;;  %v502_v26 = vsel %vm469_vm12, %v445_v18, %v486_v20  ;;  %v515_v27 = vpack.c.bf16 %v501_v22, %v499_v21 }
 0x113   : > { %v449_v28 = vadd.f32 %v448_v24, %v344_v23  ;;  %v450_v29 = vpop.f32.mrb[13].mxu0  ;;  %v516_v30 = vpack.c.bf16 %v502_v26, %v500_v25 }
 0x114   : > { %v451_v33 = vadd.f32 %v450_v29, %v344_v23  ;;  %v452_v34 = vpop.f32.mrb[14].mxu0 }
 0x115   : > { %v487_v35 = vmul.f32 %v1050_v31, %v449_v28  ;;  %v453_v36 = vadd.f32 %v452_v34, %v349_v32  ;;  %v454_v37 = vpop.f32.mrb[15].mxu0  ;;  %564 = vmatprep.subr.bf16.mxu1 %v516_v30  ;;  %vm470_vm13 = vcmp.ge.f32.partialorder %v449_v28, 0.0 }
 0x116   : > { %v488_v38 = vmul.f32 %v1050_v31, %v451_v33  ;;  %v455_v39 = vadd.f32 %v454_v37, %v349_v32  ;;  %565 = vmatpush1.bf16.msra.mxu1 %v515_v27  ;;  %vm471_vm14 = vcmp.ge.f32.partialorder %v451_v33, 0.0 }
 0x117   : > { %vm472_vm15 = vcmp.ge.f32.partialorder %v453_v36, 0.0  ;;  %v489_v40 = vmul.f32 %v1050_v31, %v453_v36  ;;  %v503_v42 = vsel %vm470_vm13, %v449_v28, %v487_v35 }
 0x118   : > { %vm473_vm0 = vcmp.ge.f32.partialorder %v455_v39, 0.0  ;;  %v490_v41 = vmul.f32 %v1050_v31, %v455_v39  ;;  %v504_v44 = vsel %vm471_vm14, %v451_v33, %v488_v38  ;;  %v808_v31 = vld [vmem:[%s1137_s3 + $0x8] sm:$0xff]  }
 0x119   : > { %v505_v43 = vsel %vm472_vm15, %v453_v36, %v489_v40 }
 0x11a   : > { %v506_v45 = vsel %vm473_vm0, %v455_v39, %v490_v41  ;;  %v517_v46 = vpack.c.bf16 %v505_v43, %v503_v42 }
 0x11b   : > { %v518_v47 = vpack.c.bf16 %v506_v45, %v504_v44 }
 0x11d   : > { %566 = vmatprep.subr.bf16.mxu1 %v518_v47 }
 0x11e   : > { %567 = vmatpush1.bf16.msra.mxu1 %v517_v46 }
 0x121   : > { %734 = vmatmul.mubr.msk.bf16.vlgmr.msra.gmra.mrb[0].mxu1 %vm553_vm1, %v807_v48 }
 0x122   : > { %602 = vmatprep.mubr.bf16.mxu1 %v889_v0 }
 0x129   : > { %735 = vmatmul.mubr.msk.bf16.gmra.mrb[4].mxu1 %vm553_vm1, %v808_v31 }
 0x1f4   : > { %v594_v50 = vpop.f32.mrb[0].mxu1 }
 0x1f5   : > { %v595_v51 = vadd.f32 %v594_v50, %v526_v49  ;;  %v596_v52 = vpop.f32.mrb[1].mxu1 }
 0x1f6   : > { %v597_v54 = vadd.f32 %v596_v52, %v526_v49  ;;  %v598_v55 = vpop.f32.mrb[2].mxu1 }
 0x1f7   : > { %613 = vst [vmem:[%s270_s9] sm:$0xff] %v595_v51  ;;  %v599_v56 = vadd.f32 %v598_v55, %v531_v53  ;;  %v600_v0 = vpop.f32.mrb[3].mxu1 }
 0x1f8   : > { %614 = vst [vmem:[%s270_s9 + $0x8] sm:$0xff] %v597_v54  ;;  %v601_v57 = vadd.f32 %v600_v0, %v531_v53 }
 0x1f9   : > { %615 = vst [vmem:[%s270_s9 + $0x10] sm:$0xff] %v599_v56 }
 0x1fa   : > { %616 = vst [vmem:[%s270_s9 + $0x18] sm:$0xff] %v601_v57 }
 0x1fc   : > { %v604_v59 = vpop.f32.mrb[4].mxu1 }
 0x1fd   : > { %v605_v60 = vadd.f32 %v604_v59, %v536_v58  ;;  %v606_v61 = vpop.f32.mrb[5].mxu1 }
 0x1fe   : > { %v607_v63 = vadd.f32 %v606_v61, %v536_v58  ;;  %v608_v1 = vpop.f32.mrb[6].mxu1 }
 0x1ff   : > { %617 = vst [vmem:[%s270_s9 + $0x20] sm:$0xff] %v605_v60  ;;  %v609_v2 = vadd.f32 %v608_v1, %v541_v62  ;;  %v610_v3 = vpop.f32.mrb[7].mxu1 }
 0x200   : > { %618 = vst [vmem:[%s270_s9 + $0x28] sm:$0xff] %v607_v63  ;;  %v611_v4 = vadd.f32 %v610_v3, %v541_v62 }
 0x201   : > { %619 = vst [vmem:[%s270_s9 + $0x30] sm:$0xff] %v609_v2 }
 0x202   : > { %620 = vst [vmem:[%s270_s9 + $0x38] sm:$0xff] %v611_v4 }
 0x203   : > { %822 = shalt.err (!%p819_p5)
}
 0x204   : > { %s823_s21 = scalar_lea.hbm %s1082_s16, 1024  ;;  %s827_s29 = scalar_lea.hbm %s1140_s6, 2048 }
 0x205   : > { %p824_p6 = scmp.ne.s32.totalorder %s1082_s16, %s823_s21  ;;  %p828_p10 = scmp.lt.u32.totalorder %s1082_s16, %s1140_s6 }
 0x206   : > { %p829_p11 = scmp.lt.u32.totalorder %s827_s29, %s823_s21  ;;  %p831_p13 = scmp.lt.u32.totalorder %s823_s21, %s1082_s16 }
 0x207   : > { %p825_p7 = pnand %p824_p6, %p971_p4 }
 0x208   : > { %p830_p12 = por %p829_p11, %p828_p10 }
 0x209   : > { %p826_p9 = pneg %p825_p7 }
 0x20a   : > { %p832_p0 = por %p831_p13, %p830_p12 }
 0x20c   : > { %p833_p1 = pnand %p832_p0, %p826_p9 }
 0x20e   : > { %836 = shalt.err (!%p833_p1)
}
 0x20f   : > { %s891_s12 = smov 256   ;;  %s892_s14 = smov 16  }
 0x210   : > { %743 = dma.vmem_to_hbm [thread:$0]  (%p971_p4), %s1084_s13, 1024, %s1082_s16, %s1088_s26, %s891_s12, %s891_s12, %s892_s14  }
 0x211 PF: > { %p749_p2 = scmp.ge.s32.totalorder %s887_s28, 2  ;;  %s652_s15 = sand.u32 1, %s867_s23  }
 0x212   : > { %s653_s17 = scalar_lea.sflag [#allocation4], %s652_s15 }
 0x213   : > { %p746_p3 = pnand %p749_p2, %p978_p8 }
 0x215   : > { %862 = dma.done.wait (!%p746_p3), %s653_s17, 1024  }
 0x216   : > { %864 = vsyncadd (!%p746_p3), %s653_s17, 4294966272  ;;  %s20_s28 = sadd.s32 1, %s887_s28   ;;  %s1143_s23 = smov %s871_s24 }
 0x217   : > { %p17_p5 = scmp.ge.s32.totalorder %s20_s28, 4   ;;  %s1144_s24 = smov %s875_s25 }
 0x218   : > { %s1145_s25 = smov %s984_s11  ;;  %s1146_s26 = smov %s883_s27 }
 0x219   : > { %s1147_s27 = smov %s1149_s30  ;;  %19 = sbr.rel (!%p17_p5) target bundleno = 6 (0x6), region = 79 }
 0x220   :  { %658 = vsyncpa [#allocation4], 1 }
 0x221   :  { %660 = vsyncpa [#allocation4 + $0x1], 1 }

</bundles_post_ra>
